<compile_context>
chip_gen: v7x
topology: tpu7x:2x2x1
jax: 0.10.0
libtpu: 0.0.40
codegen_flags: <defaults>
</compile_context>

<pallas_src>
import math
from functools import partial

import jax
import jax.numpy as jnp
from jax import lax
from jax.experimental import pallas as pl
from jax.experimental.pallas import tpu as pltpu


def fused_downsample(x, weight, bias, *, padding=0):
    """x: [B, CIN, HIN, WIN], weight: [COUT, CIN, K, K], bias: [COUT] -> [B, COUT, HOUT, WOUT]."""
    B, CIN, HIN, WIN = x.shape
    COUT, CIN2, K, K2 = weight.shape
    assert CIN2 == CIN and K2 == K
    KP = K + 1                                   # fused ("blurred") kernel size
    PAD = padding
    HP, WP = HIN + 2 * PAD, WIN + 2 * PAD        # zero-padded spatial size
    assert K % 2 == 1 and HP % 2 == 0 and WP % 2 == 0, \
        "pair-fold im2col needs odd K and even padded spatial sizes"
    HOUT = (HP - KP) // 2 + 1
    WOUT = (WP - KP) // 2 + 1
    HP2, WP2 = HP // 2, WP // 2
    KCIN = KP * KP * CIN                         # contraction length of the single matmul
    ROWS = HOUT * WOUT                           # output rows per image
    PADC = PAD * CIN

    # ---- weight-side preprocessing (tiny; mirrors the eager blur in the PyTorch fwd) ----
    # Equal-lr scale and the /4 are folded in ONCE here (hoisted out of any tap loop).
    mult = math.sqrt(2.0 / (CIN * K * K))
    ws = weight * mult
    wp = jnp.pad(ws, ((0, 0), (0, 0), (1, 1), (1, 1)))
    wblur = (wp[:, :, 1:, 1:] + wp[:, :, :-1, 1:]
             + wp[:, :, 1:, :-1] + wp[:, :, :-1, :-1]) * 0.25         # [COUT, CIN, KP, KP]
    # row ordering (dy, dx, cin) matches the slab lane ordering built in the kernel
    w_eff = jnp.transpose(wblur, (2, 3, 1, 0)).reshape(KCIN, COUT)     # [KP*KP*CIN, COUT]

    # ---- activation plumbing: ONLY the NCHW->NHWC transpose (reshape below is free) -----
    x_nhwc = jnp.transpose(x, (0, 2, 3, 1))                            # [B, H, W, CIN]
    x_flat = x_nhwc.reshape(B, HIN, WIN * CIN)                         # free trailing merge

    def kernel(x_ref, w_ref, b_ref, o_ref):
        # x_ref : [1, HIN, WIN*CIN]  one image, (W, CIN) flattened into lanes
        # w_ref : [KCIN, COUT]       prebuilt blurred weight (VMEM-resident across grid)
        # b_ref : [1, COUT]
        # o_ref : [1, ROWS, COUT]
        xr = x_ref[0]                                                  # [HIN, WIN*CIN]

        # --- zero-pad W (lane concat) then fold W-pairs into lanes -------------------
        if PADC > 0:
            zl = jnp.zeros((HIN, PADC), xr.dtype)
            xr = jnp.concatenate([zl, xr, zl], axis=1)                 # [HIN, WP*CIN]
        xr = xr.reshape(HIN, WP2, 2 * CIN)                             # [HIN, WP2, 2*CIN]

        # --- zero-pad H (cheap leading-dim concat) ------------------------------------
        if PAD > 0:
            zr = jnp.zeros((PAD, WP2, 2 * CIN), xr.dtype)
            xr = jnp.concatenate([zr, xr, zr], axis=0)                 # [HP, WP2, 2*CIN]

        # --- stride-2 tap windows ------------------------------------------------------
        # Output column ox needs W-pairs (ox + j) for j = 0..KP//2-1; slicing only along
        # the pair axis keeps each window a contiguous static slice (no strided gather,
        # no per-tap reshape).  The H stride-2 split is a free leading-dim reshape.
        wins = []
        for j in range(KP // 2):
            w_j = xr[:, j:j + WOUT, :]                                 # [HP, WOUT, 2*CIN]
            wins.append(w_j.reshape(HP2, 2, WOUT, 2 * CIN))            # padded row h = 2*q + p

        # --- assemble the lane-dense im2col slab and run ONE matmul --------------------
        # slab lane index = dy*KP*CIN + dx*CIN + c  (matches w_ref row ordering).
        pieces = []
        for dy in range(KP):
            py, qy = dy % 2, dy // 2
            for j in range(KP // 2):
                pieces.append(wins[j][qy:qy + HOUT, py])               # [HOUT, WOUT, 2*CIN]
        slab = jnp.concatenate(pieces, axis=-1)                        # [HOUT, WOUT, KCIN]
        slab = slab.reshape(ROWS, KCIN)                                # lane-dense [64, 256]

        # TODO(synk): for production v5e/v6e, cast slab/w_ref to bfloat16 (f32 accumulate)
        # for ~3x MXU throughput once the tolerance budget at real sizes is confirmed.
        acc = jnp.dot(slab, w_ref[...], preferred_element_type=jnp.float32)
        o_ref[0] = (acc + b_ref[...]).astype(o_ref.dtype)

    # NOTE: at StyleGAN channel counts (COUT >= 128, big H*W) you would additionally tile
    # the slab over output-row blocks and COUT (extra "parallel" grid axes); the COUT=32
    # test shape keeps a single masked store per step, which is negligible here.
    out_flat = pl.pallas_call(
        kernel,
        out_shape=jax.ShapeDtypeStruct((B, ROWS, COUT), jnp.float32),
        grid_spec=pltpu.PrefetchScalarGridSpec(
            num_scalar_prefetch=0,
            grid=(B,),
            in_specs=[
                pl.BlockSpec((1, HIN, WIN * CIN), lambda b: (b, 0, 0)),
                pl.BlockSpec((KCIN, COUT), lambda b: (0, 0)),   # constant -> stays resident
                pl.BlockSpec((1, COUT), lambda b: (0, 0)),      # constant -> stays resident
            ],
            out_specs=pl.BlockSpec((1, ROWS, COUT), lambda b: (b, 0, 0)),
        ),
        compiler_params=pltpu.CompilerParams(
            dimension_semantics=("parallel",),                  # megacore split over batch
            vmem_limit_bytes=32 * 1024 * 1024,
        ),
    )(x_flat, w_eff, bias.reshape(1, COUT))

    out = out_flat.reshape(B, HOUT, WOUT, COUT)
    return jnp.transpose(out, (0, 3, 1, 2))                            # NCHW


# ------------------------------------ pure-JAX reference -------------------------------

def reference_forward(x, weight, bias, *, padding=0):
    CIN, K = weight.shape[1], weight.shape[2]
    mult = math.sqrt(2.0 / (CIN * K * K))
    w = weight * mult
    wpad = jnp.pad(w, ((0, 0), (0, 0), (1, 1), (1, 1)))
    w_eff = (wpad[:, :, 1:, 1:] + wpad[:, :, :-1, 1:]
             + wpad[:, :, 1:, :-1] + wpad[:, :, :-1, :-1]) / 4
    out = lax.conv_general_dilated(
        x, w_eff, window_strides=(2, 2),
        padding=[(padding, padding), (padding, padding)],
        dimension_numbers=("NCHW", "OIHW", "NCHW"),
        precision=lax.Precision.HIGHEST)
    return out + bias[None, :, None, None]


# ------------------------------------------ main ---------------------------------------

if __name__ == "__main__":
    B, CIN, COUT, K, PAD = 2, 16, 32, 3, 1
    HIN = WIN = 16

    key = jax.random.PRNGKey(0)
    kx, kw, kb = jax.random.split(key, 3)
    x = jax.random.normal(kx, (B, CIN, HIN, WIN), dtype=jnp.float32)
    weight = jax.random.normal(kw, (COUT, CIN, K, K), dtype=jnp.float32)
    bias = 0.1 * jax.random.normal(kb, (COUT,), dtype=jnp.float32)

    fwd = jax.jit(partial(fused_downsample, padding=PAD))
    out = jax.block_until_ready(fwd(x, weight, bias))

    HOUT = (HIN + 2 * PAD - (K + 1)) // 2 + 1
    assert out.shape == (B, COUT, HOUT, HOUT) and out.dtype == jnp.float32

    ref = reference_forward(x, weight, bias, padding=PAD)
    err = float(jnp.max(jnp.abs(out - ref)))
    assert jnp.allclose(out, ref, atol=1e-2, rtol=1e-2), f"max abs err = {err}"

    print("KERNEL_OK")
</pallas_src>

<mosaic_0001>
module attributes {stable_mosaic.version = 11 : i64} {
  func.func @kernel(%arg0: i32, %arg1: memref<1x16x256xf32, #tpu.memory_space<vmem>>, %arg2: memref<256x32xf32, #tpu.memory_space<vmem>>, %arg3: memref<1x32xf32, #tpu.memory_space<vmem>>, %arg4: memref<1x64x32xf32, #tpu.memory_space<vmem>>) attributes {dimension_semantics = [#tpu.dimension_semantics<parallel>], iteration_bounds = array<i64: 2>, scalar_prefetch = 0 : i64, scratch_operands = 0 : i64, tpu.core_type = #tpu.core_type<tc>, window_params = [{transform_indices = @transform_0, window_bounds = array<i64: 1, 16, 256>}, {pipeline_mode = #tpu.pipeline_mode<synchronous>, transform_indices = @transform_1, window_bounds = array<i64: 256, 32>}, {pipeline_mode = #tpu.pipeline_mode<synchronous>, transform_indices = @transform_2, window_bounds = array<i64: 1, 32>}, {transform_indices = @transform_3, window_bounds = array<i64: 1, 64, 32>}]} {
    %c0 = arith.constant 0 : index
    %c0_0 = arith.constant 0 : index
    %c0_1 = arith.constant 0 : index
    %0 = vector.load %arg1[%c0, %c0_0, %c0_1] : memref<1x16x256xf32, #tpu.memory_space<vmem>>, vector<1x16x256xf32>
    %1 = vector.shape_cast %0 : vector<1x16x256xf32> to vector<16x256xf32>
    %cst = arith.constant 0.000000e+00 : f32
    %2 = vector.broadcast %cst : f32 to vector<16x16xf32>
    %3 = tpu.concatenate %2, %1, %2 in 1 : vector<16x16xf32>, vector<16x256xf32>, vector<16x16xf32> -> vector<16x288xf32>
    %4 = vector.shape_cast %3 : vector<16x288xf32> to vector<16x9x32xf32>
    %cst_2 = arith.constant 0.000000e+00 : f32
    %5 = vector.broadcast %cst_2 : f32 to vector<1x9x32xf32>
    %6 = tpu.concatenate %5, %4, %5 in 0 : vector<1x9x32xf32>, vector<16x9x32xf32>, vector<1x9x32xf32> -> vector<18x9x32xf32>
    %7 = vector.extract_strided_slice %6 {offsets = [0, 0, 0], sizes = [18, 8, 32], strides = [1, 1, 1]} : vector<18x9x32xf32> to vector<18x8x32xf32>
    %8 = vector.shape_cast %7 : vector<18x8x32xf32> to vector<9x2x8x32xf32>
    %9 = vector.extract_strided_slice %6 {offsets = [0, 1, 0], sizes = [18, 8, 32], strides = [1, 1, 1]} : vector<18x9x32xf32> to vector<18x8x32xf32>
    %10 = vector.shape_cast %9 : vector<18x8x32xf32> to vector<9x2x8x32xf32>
    %11 = vector.extract_strided_slice %8 {offsets = [0, 0, 0, 0], sizes = [8, 1, 8, 32], strides = [1, 1, 1, 1]} : vector<9x2x8x32xf32> to vector<8x1x8x32xf32>
    %12 = vector.shape_cast %11 : vector<8x1x8x32xf32> to vector<8x8x32xf32>
    %13 = vector.extract_strided_slice %10 {offsets = [0, 0, 0, 0], sizes = [8, 1, 8, 32], strides = [1, 1, 1, 1]} : vector<9x2x8x32xf32> to vector<8x1x8x32xf32>
    %14 = vector.shape_cast %13 : vector<8x1x8x32xf32> to vector<8x8x32xf32>
    %15 = vector.extract_strided_slice %8 {offsets = [0, 1, 0, 0], sizes = [8, 1, 8, 32], strides = [1, 1, 1, 1]} : vector<9x2x8x32xf32> to vector<8x1x8x32xf32>
    %16 = vector.shape_cast %15 : vector<8x1x8x32xf32> to vector<8x8x32xf32>
    %17 = vector.extract_strided_slice %10 {offsets = [0, 1, 0, 0], sizes = [8, 1, 8, 32], strides = [1, 1, 1, 1]} : vector<9x2x8x32xf32> to vector<8x1x8x32xf32>
    %18 = vector.shape_cast %17 : vector<8x1x8x32xf32> to vector<8x8x32xf32>
    %19 = vector.extract_strided_slice %8 {offsets = [1, 0, 0, 0], sizes = [8, 1, 8, 32], strides = [1, 1, 1, 1]} : vector<9x2x8x32xf32> to vector<8x1x8x32xf32>
    %20 = vector.shape_cast %19 : vector<8x1x8x32xf32> to vector<8x8x32xf32>
    %21 = vector.extract_strided_slice %10 {offsets = [1, 0, 0, 0], sizes = [8, 1, 8, 32], strides = [1, 1, 1, 1]} : vector<9x2x8x32xf32> to vector<8x1x8x32xf32>
    %22 = vector.shape_cast %21 : vector<8x1x8x32xf32> to vector<8x8x32xf32>
    %23 = vector.extract_strided_slice %8 {offsets = [1, 1, 0, 0], sizes = [8, 1, 8, 32], strides = [1, 1, 1, 1]} : vector<9x2x8x32xf32> to vector<8x1x8x32xf32>
    %24 = vector.shape_cast %23 : vector<8x1x8x32xf32> to vector<8x8x32xf32>
    %25 = vector.extract_strided_slice %10 {offsets = [1, 1, 0, 0], sizes = [8, 1, 8, 32], strides = [1, 1, 1, 1]} : vector<9x2x8x32xf32> to vector<8x1x8x32xf32>
    %26 = vector.shape_cast %25 : vector<8x1x8x32xf32> to vector<8x8x32xf32>
    %27 = tpu.concatenate %12, %14, %16, %18, %20, %22, %24, %26 in 2 : vector<8x8x32xf32>, vector<8x8x32xf32>, vector<8x8x32xf32>, vector<8x8x32xf32>, vector<8x8x32xf32>, vector<8x8x32xf32>, vector<8x8x32xf32>, vector<8x8x32xf32> -> vector<8x8x256xf32>
    %28 = vector.shape_cast %27 : vector<8x8x256xf32> to vector<64x256xf32>
    %c0_3 = arith.constant 0 : index
    %c0_4 = arith.constant 0 : index
    %29 = vector.load %arg2[%c0_3, %c0_4] : memref<256x32xf32, #tpu.memory_space<vmem>>, vector<256x32xf32>
    %cst_5 = arith.constant dense<0.000000e+00> : vector<64x32xf32>
    %30 = tpu.matmul %28, %29, %cst_5 {dimension_numbers = #tpu.dot_dimension_numbers<[1], [0], [0], [1], [0, 0, 1, 1], [], []>} : vector<64x256xf32>, vector<256x32xf32>, vector<64x32xf32> -> vector<64x32xf32>
    %c0_6 = arith.constant 0 : index
    %c0_7 = arith.constant 0 : index
    %31 = vector.load %arg3[%c0_6, %c0_7] : memref<1x32xf32, #tpu.memory_space<vmem>>, vector<1x32xf32>
    %32 = vector.broadcast %31 : vector<1x32xf32> to vector<64x32xf32>
    %33 = arith.addf %30, %32 : vector<64x32xf32>
    %c0_8 = arith.constant 0 : index
    %c0_9 = arith.constant 0 : index
    %c0_10 = arith.constant 0 : index
    %34 = vector.load %arg4[%c0_8, %c0_9, %c0_10] : memref<1x64x32xf32, #tpu.memory_space<vmem>>, vector<1x64x32xf32>
    %35 = vector.shape_cast %34 : vector<1x64x32xf32> to vector<64x32xf32>
    %36 = vector.shape_cast %33 : vector<64x32xf32> to vector<1x64x32xf32>
    tpu.vector_store %arg4[%c0_8, %c0_9, %c0_10], %36 {strides = array<i32>} : memref<1x64x32xf32, #tpu.memory_space<vmem>>, vector<1x64x32xf32>,
    return
  }
  func.func @transform_0(%arg0: i32) -> (i32, i32, i32) {
    %c0_i32 = arith.constant 0 : i32
    %c0_i32_0 = arith.constant 0 : i32
    %c0_i32_1 = arith.constant 0 : i32
    return %arg0, %c0_i32, %c0_i32_0 : i32, i32, i32
  }
  func.func @transform_1(%arg0: i32) -> (i32, i32) {
    %c0_i32 = arith.constant 0 : i32
    %c0_i32_0 = arith.constant 0 : i32
    %c0_i32_1 = arith.constant 0 : i32
    return %c0_i32, %c0_i32_0 : i32, i32
  }
  func.func @transform_2(%arg0: i32) -> (i32, i32) {
    %c0_i32 = arith.constant 0 : i32
    %c0_i32_0 = arith.constant 0 : i32
    %c0_i32_1 = arith.constant 0 : i32
    return %c0_i32, %c0_i32_0 : i32, i32
  }
  func.func @transform_3(%arg0: i32) -> (i32, i32, i32) {
    %c0_i32 = arith.constant 0 : i32
    %c0_i32_0 = arith.constant 0 : i32
    %c0_i32_1 = arith.constant 0 : i32
    return %arg0, %c0_i32, %c0_i32_0 : i32, i32, i32
  }
}

</mosaic_0001>

<bundles_post_ra>
// kernel: fused_downsample.1
= control target key start
LH: loop header
LB: loop body
LE: loop exit
PB: predicated region body
PF: predicated region fallthrough
CT: control target
= control target key end

     0   :  { %8 = vsyncpa [#allocation3], 0  ;;  %s1886_s0 = inlined_call_operand.vmem [shape: f32[2,16,256], index: 0, kind: input, shape index: {}]   ;;  %s1887_s1 = inlined_call_operand.vmem [shape: f32[256,32], index: 1, kind: input, shape index: {}]   ;;  %s1888_s2 = inlined_call_operand.vmem [shape: f32[1,32], index: 2, kind: input, shape index: {}]   ;;  %s1889_s3 = inlined_call_operand.hbm [shape: f32[2,64,32], index: 3, kind: output, shape index: {}]  }
   0x1   :  { %10 = vsyncpa [#allocation3 + $0x1], 0  ;;  %s1350_s12 = smov 0   ;;  %s1352_s13 = smov 0  }
   0x2   :  { %s1354_s14 = smov 0   ;;  %s1356_s15 = smov 0  }
   0x3 LB: > { %s1371_s16 = sadd.s32 4294967295, %s1318_s15   ;;  %s1029_s17 = sadd.s32 4294967294, %s1318_s15   ;;  %s1318_s15 = sphi %s1356_s15, %s1895_s15   ;;  %s1314_s14 = sphi %s1354_s14, %s1894_s14   ;;  %s1310_s13 = sphi %s1352_s13, %s1893_s13   ;;  %s1306_s12 = sphi %s1350_s12, %s1892_s12  }
   0x4   : > { %s1375_s18 = sadd.s32 1, %s1318_s15   ;;  %s91_s19 = sadd.s32 1, %s1314_s14 }
   0x5   : > { %s88_s20 = ssub.s32 %s1318_s15, %s1375_s18  ;;  %p101_p0 = scmp.ne.s32.totalorder %s1314_s14, %s1310_s13 }
   0x6   : > { %p89_p1 = scmp.eq.s32.totalorder %s88_s20, 0  ;;  %p102_p2 = scmp.eq.s32.totalorder %s1371_s16, 1 }
   0x7   : > { %p107_p3 = scmp.ne.s32.totalorder %s1310_s13, %s1306_s12  ;;  %p108_p4 = scmp.eq.s32.totalorder %s1029_s17, 1 }
   0x8   : > { %s1386_s21 = scalar_select %p89_p1, %s1314_s14, %s91_s19  }
   0x9   : > { %p1388_p5 = por %p102_p2, %p101_p0  ;;  %p1392_p6 = por %p108_p4, %p107_p3 }
   0xa   : > { %p1032_p7 = scmp.ge.s32.totalorder %s1318_s15, 1  ;;  %p140_p8 = scmp.lt.s32.totalorder %s1318_s15, 3 }
   0xc   : > { %p141_p9 = pnand %p1032_p7, %p140_p8 }
   0xd   : > { %p164_p10 = scmp.lt.s32.totalorder (!%p141_p9), %s1371_s16, 1  ;;  %s1320_s29 = smov (!%p141_p9), 16   ;;  %vm185_vm0 = vcmask (!%p141_p9), 130048   ;;  %v817_v12 = vld [vmem:[%s1887_s1 + $0x80] sm:$0xff] (!%p141_p9)  ;;  %v818_v13 = vld [vmem:[%s1887_s1 + $0x88] sm:$0xff] (!%p141_p9)  ;;  %v819_v17 = vld [vmem:[%s1887_s1 + $0x90] sm:$0xff] (!%p141_p9)  ;;  %v241_v38 = vlaneseq (!%p141_p9) }
   0xe   : > { %144 = sbr.rel (%p141_p9) target bundleno = 669 (0x29d), region = 32  ;;  %s1321_s30 = smov (!%p141_p9), 96   ;;  %v801_v14 = vld [vmem:[%s1887_s1] sm:$0xff] (!%p141_p9)  ;;  %v1100_v15 = vpack.c.bf16 (!%p141_p9), %v818_v13, %v817_v12  ;;  %v802_v16 = vld [vmem:[%s1887_s1 + $0x8] sm:$0xff] (!%p141_p9)  ;;  %v820_v18 = vld [vmem:[%s1887_s1 + $0x98] sm:$0xff] (!%p141_p9)  ;;  %v1326_v49 = vmov (!%p141_p9), 0.0  }
   0xf   : > { %s1322_s4 = smov (!%p141_p9), 64   ;;  %s1323_s5 = smov (!%p141_p9), 32   ;;  %v1102_v19 = vpack.c.bf16 (!%p141_p9), %v802_v16, %v801_v14  ;;  %v1104_v20 = vpack.c.bf16 (!%p141_p9), %v820_v18, %v819_v17  ;;  %v803_v21 = vld [vmem:[%s1887_s1 + $0x10] sm:$0xff] (!%p141_p9)  ;;  %v804_v22 = vld [vmem:[%s1887_s1 + $0x18] sm:$0xff] (!%p141_p9)  ;;  %v821_v23 = vld [vmem:[%s1887_s1 + $0xa0] sm:$0xff] (!%p141_p9)  ;;  %v242_v40 = vshrl.u32 (!%p141_p9), %v241_v38, 7 }
  0x10   : > { %1101 = vmatprep.subr.bf16.mxu0 (!%p141_p9), %v1100_v15  ;;  %1132 = vmatprep.subr.bf16.mxu1 (!%p141_p9), %v1100_v15  ;;  %v822_v24 = vld [vmem:[%s1887_s1 + $0xa8] sm:$0xff] (!%p141_p9)  ;;  %v1106_v25 = vpack.c.bf16 (!%p141_p9), %v804_v22, %v803_v21  ;;  %v805_v27 = vld [vmem:[%s1887_s1 + $0x20] sm:$0xff] (!%p141_p9)  ;;  %v823_v29 = vld [vmem:[%s1887_s1 + $0xb0] sm:$0xff] (!%p141_p9)  ;;  %v1324_v36 = vmov (!%p141_p9), 1983009808   ;;  %vm621_vm1 = vcmask (!%p141_p9), 1046528  }
  0x11   : > { %1103 = vmatpush3.bf16.msra.mxu0 (!%p141_p9), %v1102_v19  ;;  %1140 = vmatpush3.bf16.msra.mxu1 (!%p141_p9), %v1102_v19  ;;  %v1108_v26 = vpack.c.bf16 (!%p141_p9), %v822_v24, %v821_v23  ;;  %v806_v28 = vld [vmem:[%s1887_s1 + $0x28] sm:$0xff] (!%p141_p9)  ;;  %v824_v30 = vld [vmem:[%s1887_s1 + $0xb8] sm:$0xff] (!%p141_p9)  ;;  %v807_v33 = vld [vmem:[%s1887_s1 + $0x30] sm:$0xff] (!%p141_p9)  ;;  %v239_v37 = vunpack.c.l.s4 (!%p141_p9), %v1324_v36  ;;  %v1325_v41 = vmov (!%p141_p9), 1934713408   ;;  %vm771_vm2 = vcmask (!%p141_p9), 261120  }
  0x12   : > { %1105 = vmatprep.subr.bf16.mxu0 (!%p141_p9), %v1104_v20  ;;  %1133 = vmatprep.subr.bf16.mxu1 (!%p141_p9), %v1104_v20  ;;  %v1110_v31 = vpack.c.bf16 (!%p141_p9), %v806_v28, %v805_v27  ;;  %v1112_v32 = vpack.c.bf16 (!%p141_p9), %v824_v30, %v823_v29  ;;  %v808_v34 = vld [vmem:[%s1887_s1 + $0x38] sm:$0xff] (!%p141_p9)  ;;  %v303_v42 = vunpack.c.l.s4 (!%p141_p9), %v1325_v41  ;;  %vm780_vm3 = vcmask (!%p141_p9), 523264   ;;  %s1043_s17 = sshll.u32 (!%p141_p9), %s1371_s16, 10  ;;  %s1327_s27 = smov (!%p141_p9), [#allocation2]  }
  0x13   : > { %v1114_v35 = vpack.c.bf16 (!%p141_p9), %v808_v34, %v807_v33  ;;  %v240_v39 = vunpack.c.0.s8 (!%p141_p9), %v239_v37  ;;  %vm789_vm4 = vcmask (!%p141_p9), 785408  }
  0x14   : > { %v304_v45 = vunpack.c.0.s8 (!%p141_p9), %v303_v42 }
  0x15   : > { %s165_s24 = scalar_select %p164_p10, %s1371_s16, 1  ;;  %1107 = vmatpush3.bf16.msra.mxu0 %v1106_v25  ;;  %1141 = vmatpush3.bf16.msra.mxu1 %v1106_v25  ;;  %v1490_v43 = vsub.s32 %v240_v39, %v242_v40 }
  0x16   : > { %1109 = vmatprep.subr.bf16.mxu0 %v1108_v26  ;;  %1134 = vmatprep.subr.bf16.mxu1 %v1108_v26  ;;  %v1498_v53 = vsub.s32 %v304_v45, %v242_v40 }
  0x17   : > { %s1042_s25 = sshll.u32 %s165_s24, 5 }
  0x18   : > { %s168_s28 = scalar_lea.vmem %s1886_s0, %s1042_s25  ;;  %s1835_s25 = scalar_lea.hbm %s1889_s3, %s1043_s17 }
  0x19   : > { %v171_v0 = vld [vmem:[%s168_s28 + $0x10] sm:$0xff]  ;;  %v169_v1 = vld [vmem:[%s168_s28] sm:$0xff]  ;;  %v172_v2 = vld [vmem:[%s168_s28 + $0x18] sm:$0xff]  ;;  %1111 = vmatpush3.bf16.msra.mxu0 %v1110_v31  ;;  %1142 = vmatpush3.bf16.msra.mxu1 %v1110_v31 }
  0x1a   : > { %181 = vrot.lane.b32.xlu1 %v171_v0, %s1320_s29  ;;  %177 = vrot.lane.b32.xlu0 %v169_v1, %s1320_s29  ;;  %v170_v3 = vld [vmem:[%s168_s28 + $0x8] sm:$0xff]  ;;  %s1260_s28 = sshll.u32 %s1327_s27, 4  ;;  %s1261_s28 = int_to_ptr.vmem [resolvable:$false] %s1260_s28 }
  0x1b   : > { %1113 = vmatprep.subr.bf16.mxu0 %v1112_v32  ;;  %1135 = vmatprep.subr.bf16.mxu1 %v1112_v32 }
  0x1d   : > { %1115 = vmatpush3.bf16.msra.mxu0 %v1114_v35  ;;  %1143 = vmatpush3.bf16.msra.mxu1 %v1114_v35 }
  0x1e   : > { %183 = vrot.lane.b32.xlu1 %v172_v2, %s1320_s29  ;;  %179 = vrot.lane.b32.xlu0 %v170_v3, %s1320_s29  ;;  %s1262_s29 = scalar_lea.vmem %s1261_s28, 2048 }
  0x8c   : > { %v182_v4 = vpop.permute.xlu1 %181  ;;  %v178_v5 = vpop.permute.xlu0 %177 }
  0x8d   : > { %v1404_v6 = vsel %vm185_vm0, 0.0, %v182_v4  ;;  %v1407_v7 = vsel %vm185_vm0, 0.0, %v178_v5 }
  0x8e   : > { %202 = vrot.lane.b32.xlu1 %v1404_v6, %s1321_s30  ;;  %200 = vrot.lane.b32.xlu0 %v1407_v7, %s1321_s30 }
  0x90   : > { %v1417_v8 = vpop.permute.xlu1 %183  ;;  %v180_v9 = vpop.permute.xlu0 %179 }
  0x91   : > { %v1425_v10 = vsel %vm185_vm0, %v182_v4, %v1417_v8  ;;  %v1428_v11 = vsel %vm185_vm0, %v178_v5, %v180_v9  ;;  %v196_v44 = vsel %vm185_vm0, %v180_v9, 0.0  ;;  %v197_v46 = vsel %vm185_vm0, %v1417_v8, 0.0 }
  0x92   : > { %208 = vrot.lane.b32.xlu1 %v1404_v6, %s1322_s4  ;;  %206 = vrot.lane.b32.xlu0 %v1407_v7, %s1322_s4  ;;  %v372_v50 = vcombine.high %v196_v44, %v1326_v49  ;;  %v557_v51 = vcombine.high %v197_v46, %v1326_v49  ;;  %v564_v52 = vrot.slane %v197_v46, %v1490_v43 }
  0x93   : > { %v379_v54 = vrot.slane %v196_v44, %v1490_v43 }
  0x94   : > { %v386_v56 = vrot.slane %v372_v50, %v1490_v43  ;;  %v571_v58 = vrot.slane %v557_v51, %v1490_v43  ;;  %v572_v59 = vcombine.high %v564_v52, %v1326_v49  ;;  %v1505_v60 = vrot.slane %v564_v52, %v1498_v53 }
  0x95   : > { %v387_v61 = vcombine.high %v379_v54, %v1326_v49  ;;  %v1509_v63 = vrot.slane %v379_v54, %v1498_v53 }
  0x96   : > { %214 = vrot.lane.b32.xlu1 %v1404_v6, %s1323_s5  ;;  %212 = vrot.lane.b32.xlu0 %v1407_v7, %s1323_s5  ;;  %v402_v0 = vcombine.high %v386_v56, %v1326_v49  ;;  %v1513_v3 = vrot.slane %v572_v59, %v1498_v53  ;;  %v587_v4 = vcombine.high %v571_v58, %v1326_v49  ;;  %v722_v13 = vrot.slane %v1505_v60, 1 }
  0x97   : > { %v1517_v5 = vrot.slane %v571_v58, %v1498_v53  ;;  %v1521_v8 = vcombine.high %v1505_v60, %v1326_v49  ;;  %v1526_v14 = vrot.slane %v387_v61, %v1498_v53  ;;  %v1533_v19 = vcombine.high %v1509_v63, %v1326_v49  ;;  %v814_v60 = vld [vmem:[%s1887_s1 + $0x68] sm:$0xff] }
  0x98   : > { %v1529_v18 = vrot.slane %v402_v0, %v1498_v53  ;;  %v1540_v23 = vrot.slane %v587_v4, %v1498_v53  ;;  %v1543_v24 = vrot.slane %v386_v56, %v1498_v53  ;;  %v1549_v27 = vcombine.high %v1513_v3, %v1326_v49 }
  0x99   : > { %v637_v30 = vrot.slane %v1521_v8, 1  ;;  %v725_v31 = vrot.slane %v1513_v3, 1  ;;  %v625_v34 = vrot.slane %v1533_v19, 1  ;;  %v710_v8 = vrot.slane %v1509_v63, 1  ;;  %v811_v63 = vld [vmem:[%s1887_s1 + $0x50] sm:$0xff] }
  0x9a   : > { %220 = vrot.lane.b32.xlu1 %v1425_v10, %s1321_s30  ;;  %218 = vrot.lane.b32.xlu0 %v1428_v11, %s1321_s30  ;;  %v1574_v38 = vcombine.high %v1529_v18, %v1326_v49  ;;  %v716_v19 = vrot.slane %v1543_v24, 1 }
  0x9e   : > { %226 = vrot.lane.b32.xlu1 %v1425_v10, %s1322_s4  ;;  %224 = vrot.lane.b32.xlu0 %v1428_v11, %s1322_s4 }
  0xa2   : > { %232 = vrot.lane.b32.xlu1 %v1425_v10, %s1323_s5  ;;  %230 = vrot.lane.b32.xlu0 %v1428_v11, %s1323_s5 }
 0x100   : > { %v203_v47 = vpop.permute.xlu1 %202  ;;  %v201_v48 = vpop.permute.xlu0 %200 }
 0x104   : > { %v209_v55 = vpop.permute.xlu1 %208  ;;  %v207_v57 = vpop.permute.xlu0 %206 }
 0x105   : > { %v421_v9 = vcombine.low %v1404_v6, %v209_v55  ;;  %v422_v20 = vcombine.high %v1404_v6, %v209_v55  ;;  %v236_v25 = vcombine.low %v1407_v7, %v207_v57  ;;  %v237_v26 = vcombine.high %v1407_v7, %v207_v57 }
 0x106   : > { %v1553_v6 = vcombine.high %v1517_v5, %v1326_v49 }
 0x107   : > { %v429_v28 = vrot.slane %v421_v9, %v1490_v43  ;;  %v1569_v35 = vrot.slane %v422_v20, %v1490_v43  ;;  %v244_v39 = vrot.slane %v236_v25, %v1490_v43  ;;  %v251_v40 = vrot.slane %v237_v26, %v1490_v43 }
 0x108   : > { %v215_v62 = vpop.permute.xlu1 %214  ;;  %v213_v2 = vpop.permute.xlu0 %212 }
 0x109   : > { %v437_v1 = vcombine.low %v203_v47, %v215_v62  ;;  %v438_v12 = vcombine.high %v203_v47, %v215_v62  ;;  %v252_v15 = vcombine.low %v201_v48, %v213_v2  ;;  %v253_v16 = vcombine.high %v201_v48, %v213_v2  ;;  %v809_v2 = vld [vmem:[%s1887_s1 + $0x40] sm:$0xff] }
 0x10b   : > { %v1537_v21 = vrot.slane %v437_v1, %v1490_v43  ;;  %v1557_v29 = vrot.slane %v438_v12, %v1490_v43  ;;  %v1562_v32 = vrot.slane %v252_v15, %v1490_v43  ;;  %v1565_v7 = vrot.slane %v253_v16, %v1490_v43  ;;  %v825_v1 = vld [vmem:[%s1887_s1 + $0xc0] sm:$0xff]  ;;  %v810_v16 = vld [vmem:[%s1887_s1 + $0x48] sm:$0xff] }
 0x10c   : > { %v221_v17 = vpop.permute.xlu1 %220  ;;  %v219_v22 = vpop.permute.xlu0 %218 }
 0x10d   : > { %v485_v36 = vcombine.low %v429_v28, %v1537_v21  ;;  %v486_v44 = vcombine.high %v429_v28, %v1537_v21  ;;  %v501_v45 = vcombine.low %v1569_v35, %v1557_v29  ;;  %v502_v46 = vcombine.high %v1569_v35, %v1557_v29 }
 0x10e   : > { %v300_v48 = vcombine.low %v244_v39, %v1562_v32  ;;  %v301_v50 = vcombine.high %v244_v39, %v1562_v32  ;;  %v316_v51 = vcombine.low %v251_v40, %v1565_v7  ;;  %v317_v55 = vcombine.high %v251_v40, %v1565_v7 }
 0x110   : > { %v227_v33 = vpop.permute.xlu1 %226  ;;  %v225_v37 = vpop.permute.xlu0 %224 }
 0x111   : > { %v453_v41 = vcombine.low %v1425_v10, %v227_v33  ;;  %v454_v42 = vcombine.high %v1425_v10, %v227_v33  ;;  %v268_v47 = vcombine.low %v1428_v11, %v225_v37  ;;  %v269_v52 = vcombine.high %v1428_v11, %v225_v37  ;;  %v826_v11 = vld [vmem:[%s1887_s1 + $0xc8] sm:$0xff] }
 0x112   : > { %v493_v10 = vrot.slane %v485_v36, %v1498_v53  ;;  %v1116_v15 = vpack.c.bf16 %v826_v11, %v825_v1  ;;  %v500_v36 = vrot.slane %v486_v44, %v1498_v53  ;;  %v308_v37 = vrot.slane %v300_v48, %v1498_v53 }
 0x113   : > { %v461_v59 = vrot.slane %v453_v41, %v1490_v43  ;;  %v468_v61 = vrot.slane %v454_v42, %v1490_v43  ;;  %v276_v4 = vrot.slane %v268_v47, %v1490_v43 }
 0x114   : > { %v233_v54 = vpop.permute.xlu1 %232  ;;  %v231_v58 = vpop.permute.xlu0 %230  ;;  %1117 = vmatprep.subr.bf16.mxu0 %v1116_v15  ;;  %1136 = vmatprep.subr.bf16.mxu1 %v1116_v15 }
 0x115   : > { %v469_v56 = vcombine.low %v221_v17, %v233_v54  ;;  %v470_v57 = vcombine.high %v221_v17, %v233_v54  ;;  %v284_v62 = vcombine.low %v219_v22, %v231_v58  ;;  %v285_v0 = vcombine.high %v219_v22, %v231_v58 }
 0x116   : > { %v283_v17 = vrot.slane %v269_v52, %v1490_v43  ;;  %v1118_v22 = vpack.c.bf16 %v810_v16, %v809_v2  ;;  %v315_v52 = vrot.slane %v301_v50, %v1498_v53  ;;  %v324_v58 = vrot.slane %v316_v51, %v1498_v53 }
 0x117   : > { %v477_v9 = vrot.slane %v469_v56, %v1490_v43  ;;  %v484_v12 = vrot.slane %v470_v57, %v1490_v43  ;;  %v292_v20 = vrot.slane %v284_v62, %v1490_v43  ;;  %v299_v21 = vrot.slane %v285_v0, %v1490_v43 }
 0x118   : > { %1119 = vmatpush3.bf16.msra.mxu0 %v1118_v22  ;;  %1144 = vmatpush3.bf16.msra.mxu1 %v1118_v22  ;;  %v509_v56 = vrot.slane %v501_v45, %v1498_v53  ;;  %v1627_v57 = vrot.slane %v502_v46, %v1498_v53 }
 0x119   : > { %v517_v25 = vcombine.low %v461_v59, %v477_v9  ;;  %v518_v26 = vcombine.high %v461_v59, %v477_v9  ;;  %v533_v28 = vcombine.low %v468_v61, %v484_v12  ;;  %v534_v29 = vcombine.high %v468_v61, %v484_v12 }
 0x11a   : > { %v332_v32 = vcombine.low %v276_v4, %v292_v20  ;;  %v333_v7 = vcombine.high %v276_v4, %v292_v20  ;;  %v348_v33 = vcombine.low %v283_v17, %v299_v21  ;;  %v349_v35 = vcombine.high %v283_v17, %v299_v21 }
 0x11b   : > { %v525_v39 = vrot.slane %v517_v25, %v1498_v53  ;;  %v532_v40 = vrot.slane %v518_v26, %v1498_v53  ;;  %v1617_v43 = vrot.slane %v534_v29, %v1498_v53  ;;  %v541_v44 = vrot.slane %v533_v28, %v1498_v53 }
 0x11c   : > { %v340_v41 = vrot.slane %v332_v32, %v1498_v53  ;;  %v347_v42 = vrot.slane %v333_v7, %v1498_v53  ;;  %v363_v47 = vrot.slane %v349_v35, %v1498_v53  ;;  %v356_v48 = vrot.slane %v348_v33, %v1498_v53 }
 0x11d   : > { %v551_v54 = vcombine.low %v500_v36, %v532_v40  ;;  %v331_v59 = vrot.slane %v317_v55, %v1498_v53  ;;  %v549_v1 = vcombine.low %v493_v10, %v525_v39  ;;  %v1633_v50 = vcombine.high %v493_v10, %v525_v39 }
 0x11e   : > { %v1631_v61 = vcombine.high %v308_v37, %v340_v41  ;;  %v366_v62 = vcombine.low %v315_v52, %v347_v42  ;;  %v364_v0 = vcombine.low %v308_v37, %v340_v41  ;;  %v1641_v45 = vcombine.low %v1627_v57, %v1617_v43 }
 0x11f   : > { %v1635_v11 = vcombine.high %v331_v59, %v363_v47  ;;  %v1637_v2 = vcombine.low %v331_v59, %v363_v47  ;;  %v1643_v51 = vcombine.low %v324_v58, %v356_v48  ;;  %v1645_v53 = vcombine.low %v509_v56, %v541_v44  ;;  %v830_v47 = vld [vmem:[%s1887_s1 + $0xe8] sm:$0xff] }
 0x120   : > { %v1196_v46 = vpack.i.bf16 %v551_v54, %v366_v62  ;;  %v1201_v4 = vpack.i.bf16 %v549_v1, %v364_v0  ;;  %v713_v55 = vrot.slane %v1526_v14, 1  ;;  %v1649_v10 = vrot.slane %v1326_v49, 1 }
 0x121   : > { %v634_v9 = vrot.slane %v1574_v38, 1  ;;  %v1652_v12 = vcombine.high %v500_v36, %v532_v40  ;;  %v1654_v15 = vcombine.high %v509_v56, %v541_v44  ;;  %v1656_v16 = vcombine.high %v315_v52, %v347_v42  ;;  %v829_v42 = vld [vmem:[%s1887_s1 + $0xe0] sm:$0xff] }
 0x122   : > { %1197 = vrot.lane.b32.xlu0 %v1196_v46, %s1322_s4  ;;  %1202 = vrot.lane.b32.xlu1 %v1201_v4, %s1322_s4  ;;  %v624_v17 = vrot.slane %v1631_v61, 1  ;;  %v724_v20 = vrot.slane %v551_v54, 1  ;;  %v712_v21 = vrot.slane %v366_v62, 1  ;;  %v636_v22 = vrot.slane %v1633_v50, 1 }
 0x123   : > { %v633_v25 = vrot.slane %v1635_v11, 1  ;;  %v1663_v26 = vcombine.high %v324_v58, %v356_v48  ;;  %v721_v38 = vrot.slane %v549_v1, 1  ;;  %v1211_v28 = vpack.i.bf16 %v1641_v45, %v1637_v2 }
 0x124   : > { %v1206_v29 = vpack.i.bf16 %v1645_v53, %v1643_v51  ;;  %v709_v32 = vrot.slane %v364_v0, 1  ;;  %v626_v7 = vsel %vm621_vm1, %v624_v17, %v625_v34  ;;  %v638_v33 = vsel %vm621_vm1, %v636_v22, %v637_v30  ;;  %v813_v0 = vld [vmem:[%s1887_s1 + $0x60] sm:$0xff] }
 0x125   : > { %v635_v35 = vsel %vm621_vm1, %v633_v25, %v634_v9  ;;  %v640_v36 = vrot.slane %v1549_v27, 1  ;;  %v643_v37 = vrot.slane %v1553_v6, 1  ;;  %v418_v39 = vcombine.high %v1526_v14, %v1326_v49  ;;  %v827_v14 = vld [vmem:[%s1887_s1 + $0xd0] sm:$0xff]  ;;  %v828_v6 = vld [vmem:[%s1887_s1 + $0xd8] sm:$0xff] }
 0x126   : > { %v419_v40 = vcombine.high %v1543_v24, %v1326_v49  ;;  %1212 = vrot.lane.b32.xlu0 %v1211_v28, %s1322_s4  ;;  %1207 = vrot.lane.b32.xlu1 %v1206_v29, %s1322_s4  ;;  %v714_v30 = vsel %vm621_vm1, %v712_v21, %v713_v55  ;;  %v726_v27 = vsel %vm621_vm1, %v724_v20, %v725_v31  ;;  %v627_v41 = vrot.slane %v1656_v16, 1  ;;  %v812_v31 = vld [vmem:[%s1887_s1 + $0x58] sm:$0xff]  ;;  %v831_v20 = vld [vmem:[%s1887_s1 + $0xf0] sm:$0xff] }
 0x127   : > { %v1216_v34 = vpack.i.bf16 %v638_v33, %v626_v7  ;;  %v1221_v24 = vpack.i.bf16 %v635_v35, %v1649_v10  ;;  %v639_v3 = vrot.slane %v1652_v12, 1  ;;  %v711_v52 = vsel %vm621_vm1, %v709_v32, %v710_v8  ;;  %v815_v29 = vld [vmem:[%s1887_s1 + $0x70] sm:$0xff] }
 0x128   : > { %v723_v44 = vsel %vm621_vm1, %v721_v38, %v722_v13  ;;  %v630_v48 = vrot.slane %v1663_v26, 1  ;;  %v642_v54 = vrot.slane %v1654_v15, 1  ;;  %v628_v56 = vrot.slane %v418_v39, 1 }
 0x129   : > { %v631_v58 = vrot.slane %v419_v40, 1  ;;  %v718_v59 = vrot.slane %v1637_v2, 1  ;;  %v1120_v62 = vpack.c.bf16 %v828_v6, %v827_v14  ;;  %v715_v13 = vrot.slane %v1643_v51, 1  ;;  %v832_v51 = vld [vmem:[%s1887_s1 + $0xf8] sm:$0xff] }
 0x12a   : > { %1217 = vrot.lane.b32.xlu0 %v1216_v34, %s1323_s5  ;;  %1222 = vrot.lane.b32.xlu1 %v1221_v24, %s1323_s5  ;;  %v1226_v1 = vpack.i.bf16 %v726_v27, %v714_v30  ;;  %v1122_v46 = vpack.c.bf16 %v812_v31, %v811_v63  ;;  %v1124_v4 = vpack.c.bf16 %v830_v47, %v829_v42  ;;  %v727_v2 = vrot.slane %v1645_v53, 1 }
 0x12b   : > { %v1231_v55 = vpack.i.bf16 %v723_v44, %v711_v52  ;;  %v629_v9 = vsel %vm621_vm1, %v627_v41, %v628_v56  ;;  %v641_v17 = vsel %vm621_vm1, %v639_v3, %v640_v36  ;;  %1121 = vmatprep.subr.bf16.mxu0 %v1120_v62  ;;  %1137 = vmatprep.subr.bf16.mxu1 %v1120_v62  ;;  %v730_v21 = vrot.slane %v1641_v45, 1  ;;  %v816_v45 = vld [vmem:[%s1887_s1 + $0x78] sm:$0xff] }
 0x12c   : > { %v632_v22 = vsel %vm621_vm1, %v630_v48, %v631_v58  ;;  %v644_v53 = vsel %vm621_vm1, %v642_v54, %v643_v37  ;;  %1123 = vmatpush3.bf16.msra.mxu0 %v1122_v46  ;;  %1145 = vmatpush3.bf16.msra.mxu1 %v1122_v46  ;;  %v1126_v25 = vpack.c.bf16 %v814_v60, %v813_v0  ;;  %v728_v38 = vrot.slane %v1517_v5, 1 }
 0x12d   : > { %v719_v28 = vrot.slane %v1529_v18, 1  ;;  %v717_v32 = vsel %vm621_vm1, %v715_v13, %v716_v19  ;;  %v731_v7 = vrot.slane %v1540_v23, 1  ;;  %1125 = vmatprep.subr.bf16.mxu0 %v1124_v4  ;;  %1138 = vmatprep.subr.bf16.mxu1 %v1124_v4  ;;  %v1128_v5 = vpack.c.bf16 %v832_v51, %v831_v20 }
 0x12e   : > { %1227 = vrot.lane.b32.xlu0 %v1226_v1, %s1321_s30  ;;  %1232 = vrot.lane.b32.xlu1 %v1231_v55, %s1321_s30  ;;  %v1236_v33 = vpack.i.bf16 %v641_v17, %v629_v9  ;;  %v1246_v35 = vpack.i.bf16 %v644_v53, %v632_v22  ;;  %v729_v36 = vsel %vm621_vm1, %v727_v2, %v728_v38 }
 0x12f   : > { %v720_v18 = vsel %vm621_vm1, %v718_v59, %v719_v28  ;;  %v732_v37 = vsel %vm621_vm1, %v730_v21, %v731_v7  ;;  %v1756_v39 = vcombine.high %v1627_v57, %v1617_v43  ;;  %v1130_v40 = vpack.c.bf16 %v816_v45, %v815_v29 }
 0x130   : > { %1127 = vmatpush3.bf16.msra.mxu0 %v1126_v25  ;;  %1146 = vmatpush3.bf16.msra.mxu1 %v1126_v25  ;;  %v605_v8 = vcombine.high %v1540_v23, %v1326_v49  ;;  %v1241_v19 = vpack.i.bf16 %v729_v36, %v717_v32  ;;  %v1251_v30 = vpack.i.bf16 %v732_v37, %v720_v18 }
 0x131   : > { %1129 = vmatprep.subr.bf16.mxu0 %v1128_v5  ;;  %1139 = vmatprep.subr.bf16.mxu1 %v1128_v5  ;;  %v759_v27 = vrot.slane %v1756_v39, 1 }
 0x132   : > { %1237 = vrot.lane.b32.xlu0 %v1236_v33, %s1323_s5  ;;  %1247 = vrot.lane.b32.xlu1 %v1246_v35, %s1323_s5  ;;  %v760_v43 = vrot.slane %v605_v8, 1 }
 0x134   : > { %1131 = vmatpush3.bf16.msra.mxu0 %v1130_v40  ;;  %1147 = vmatpush3.bf16.msra.mxu1 %v1130_v40  ;;  %v761_v57 = vsel %vm621_vm1, %v759_v27, %v760_v43 }
 0x136   : > { %1242 = vrot.lane.b32.xlu0 %v1241_v19, %s1321_s30  ;;  %1252 = vrot.lane.b32.xlu1 %v1251_v30, %s1321_s30 }
 0x13a   : > { %762 = vrot.lane.b32.xlu0 %v761_v57, %s1323_s5  ;;  %765 = vrot.lane.b32.xlu1 %v1326_v49, %s1322_s4 }
 0x13e   : > { %768 = vrot.lane.b32.xlu0 %v1649_v10, %s1321_s30  ;;  %s161_s30 = sand.u32 1, %s1310_s13  }
 0x13f   : > { %s1033_s4 = sshll.u32 %s161_s30, 6  ;;  %s1845_s16 = scalar_lea.sflag [#allocation3], %s161_s30 }
 0x140   : > { %s1816_s11 = scalar_lea.vmem [#allocation2], %s1033_s4 }
 0x141   : > { %s967_s19 = sshll.u32 %s1816_s11, 4  ;;  %s1837_s19 = int_to_ptr.vmem [resolvable:$true] %s967_s19 }
 0x142   : > { %s1256_s26 = scalar_lea.vmem %s1837_s19, 1024  ;;  %p1263_p0 = scmp.lt.s32.totalorder %s1837_s19, %s1261_s28 }
 0x143   : > { %p1257_p11 = scmp.ne.s32.totalorder %s1837_s19, %s1256_s26  ;;  %p1264_p1 = scmp.lt.s32.totalorder %s1262_s29, %s1256_s26 }
 0x145   : > { %p1258_p12 = pnand %p1257_p11, %p1388_p5  ;;  %p1265_p2 = por %p1264_p1, %p1263_p0 }
 0x147   : > { %p1259_p13 = pneg %p1258_p12 }
 0x149   : > { %p1266_p3 = pnand %p1265_p2, %p1259_p13 }
 0x194   : > { %v1198_v23 = vpop.permute.xlu0 %1197  ;;  %v1203_v14 = vpop.permute.xlu1 %1202 }
 0x195   : > { %v1200_v44 = vunpack.i.h.bf16 %v1198_v23  ;;  %v1199_v48 = vunpack.i.l.bf16 %v1198_v23  ;;  %v1205_v54 = vunpack.i.h.bf16 %v1203_v14  ;;  %v1204_v56 = vunpack.i.l.bf16 %v1203_v14 }
 0x198   : > { %v1771_v6 = vpop.permute.xlu0 %1212  ;;  %v1208_v63 = vpop.permute.xlu1 %1207 }
 0x199   : > { %v1210_v38 = vunpack.i.h.bf16 %v1208_v63  ;;  %v1209_v28 = vunpack.i.l.bf16 %v1208_v63  ;;  %v1215_v18 = vunpack.i.h.bf16 %v1771_v6 }
 0x19c   : > { %v1218_v34 = vpop.permute.xlu0 %1217  ;;  %v1223_v24 = vpop.permute.xlu1 %1222 }
 0x19d   : > { %v1220_v41 = vunpack.i.h.bf16 %v1218_v34  ;;  %v1219_v3 = vunpack.i.l.bf16 %v1218_v34  ;;  %v1225_v31 = vunpack.i.h.bf16 %v1223_v24  ;;  %v1224_v42 = vunpack.i.l.bf16 %v1223_v24  ;;  %v1036_v34 = vld [vmem:[%s1888_s2] ss:$0 sm:$0xff] }
 0x19f   : > { %v772_v47 = vsel %vm771_vm2, 0.0, %v1224_v42  ;;  %v773_v49 = vsel %vm771_vm2, %v1631_v61, %v1219_v3  ;;  %v777_v10 = vsel %vm771_vm2, %v1633_v50, %v1220_v41  ;;  %v776_v52 = vsel %vm771_vm2, %v1635_v11, %v1225_v31 }
 0x1a0   : > { %v1228_v58 = vpop.permute.xlu0 %1227  ;;  %v1233_v59 = vpop.permute.xlu1 %1232  ;;  %v782_v1 = vsel %vm780_vm3, %v773_v49, %v1199_v48  ;;  %v786_v61 = vsel %vm780_vm3, %v777_v10, %v1200_v44  ;;  %v781_v46 = vsel %vm780_vm3, %v772_v47, %v1204_v56  ;;  %v785_v50 = vsel %vm780_vm3, %v776_v52, %v1205_v54 }
 0x1a1   : > { %v1230_v62 = vunpack.i.h.bf16 %v1228_v58  ;;  %v1229_v0 = vunpack.i.l.bf16 %v1228_v58  ;;  %v1235_v60 = vunpack.i.h.bf16 %v1233_v59  ;;  %v1234_v13 = vunpack.i.l.bf16 %v1233_v59 }
 0x1a3   : > { %v791_v11 = vsel %vm789_vm4, %v782_v1, %v1229_v0  ;;  %v795_v4 = vsel %vm789_vm4, %v786_v61, %v1230_v62  ;;  %v790_v2 = vsel %vm789_vm4, %v781_v46, %v1234_v13  ;;  %v794_v55 = vsel %vm789_vm4, %v785_v50, %v1235_v60 }
 0x1a4   : > { %v1238_v9 = vpop.permute.xlu0 %1237  ;;  %904 = vmatprep.mubr.f32.mxu0 %v791_v11  ;;  %924 = vmatprep.mubr.f32.mxu1 %v795_v4  ;;  %v1248_v17 = vpop.permute.xlu1 %1247 }
 0x1a5   : > { %v1240_v20 = vunpack.i.h.bf16 %v1238_v9  ;;  %v1239_v51 = vunpack.i.l.bf16 %v1238_v9  ;;  %v1250_v21 = vunpack.i.h.bf16 %v1248_v17  ;;  %v1249_v22 = vunpack.i.l.bf16 %v1248_v17  ;;  %905 = vmatmul.mubr.f32.vlgmr.msra.gmra.mrb[0].mxu0 %v790_v2  ;;  %925 = vmatmul.mubr.f32.vlgmr.msra.gmra.mrb[0].mxu1 %v794_v55 }
 0x1a7   : > { %v774_v53 = vsel %vm771_vm2, %v1656_v16, %v1239_v51  ;;  %v778_v25 = vsel %vm771_vm2, %v1652_v12, %v1240_v20  ;;  %v775_v32 = vsel %vm771_vm2, %v1663_v26, %v1249_v22  ;;  %v779_v7 = vsel %vm771_vm2, %v1654_v15, %v1250_v21 }
 0x1a8   : > { %v1243_v29 = vpop.permute.xlu0 %1242  ;;  %v1253_v45 = vpop.permute.xlu1 %1252  ;;  %v1214_v16 = vunpack.i.l.bf16 %v1771_v6  ;;  %v783_v12 = vsel %vm780_vm3, %v774_v53, %v1209_v28  ;;  %v787_v37 = vsel %vm780_vm3, %v778_v25, %v1210_v38  ;;  %v788_v19 = vsel %vm780_vm3, %v779_v7, %v1215_v18 }
 0x1a9   : > { %v1245_v5 = vunpack.i.h.bf16 %v1243_v29  ;;  %v1244_v33 = vunpack.i.l.bf16 %v1243_v29  ;;  %v1255_v35 = vunpack.i.h.bf16 %v1253_v45  ;;  %v1254_v36 = vunpack.i.l.bf16 %v1253_v45 }
 0x1aa   : > { %v784_v15 = vsel %vm780_vm3, %v775_v32, %v1214_v16 }
 0x1ab   : > { %v792_v40 = vsel %vm789_vm4, %v783_v12, %v1244_v33  ;;  %v796_v8 = vsel %vm789_vm4, %v787_v37, %v1245_v5  ;;  %v793_v43 = vsel %vm789_vm4, %v784_v15, %v1254_v36  ;;  %v797_v57 = vsel %vm789_vm4, %v788_v19, %v1255_v35 }
 0x1ac   : > { %v763_v26 = vpop.permute.xlu0 %762  ;;  %909 = vmatprep.mubr.f32.mxu0 %v792_v40  ;;  %929 = vmatprep.mubr.f32.mxu1 %v796_v8  ;;  %v766_v27 = vpop.permute.xlu1 %765 }
 0x1ad   : > { %v798_v30 = vsel %vm771_vm2, %v1756_v39, %v763_v26  ;;  %910 = vmatmul.mubr.f32.gmra.mrb[2].mxu0 %v791_v11  ;;  %930 = vmatmul.mubr.f32.gmra.mrb[2].mxu1 %v795_v4 }
 0x1ae   : > { %914 = vmatprep.mubr.f32.mxu0 %v793_v43  ;;  %934 = vmatprep.mubr.f32.mxu1 %v797_v57  ;;  %v799_v23 = vsel %vm780_vm3, %v798_v30, %v766_v27 }
 0x1b0   : > { %v769_v14 = vpop.permute.xlu0 %768 }
 0x1b1   : > { %915 = vmatmul.mubr.f32.gmra.mrb[4].mxu0 %v792_v40  ;;  %935 = vmatmul.mubr.f32.gmra.mrb[4].mxu1 %v796_v8  ;;  %v800_v6 = vsel %vm789_vm4, %v799_v23, %v769_v14 }
 0x1b2   : > { %919 = vmatprep.mubr.f32.mxu0 %v794_v55  ;;  %939 = vmatprep.mubr.f32.mxu1 %v800_v6 }
 0x1b5   : > { %920 = vmatmul.mubr.f32.gmra.mrb[6].mxu0 %v793_v43  ;;  %940 = vmatmul.mubr.f32.gmra.mrb[6].mxu1 %v797_v57 }
 0x278   : > { %v1076_v39 = vpop.f32.mrb[0].mxu0  ;;  %v1088_v63 = vpop.f32.mrb[0].mxu1 }
 0x279   : > { %v1077_v24 = vpop.f32.mrb[1].mxu0  ;;  %v1089_v41 = vpop.f32.mrb[1].mxu1 }
 0x27a   : > { %v1078_v3 = vadd.f32 %v1077_v24, %v1076_v39  ;;  %v1090_v31 = vadd.f32 %v1089_v41, %v1088_v63 }
 0x27c   : > { %v907_v42 = vadd.f32 %v1078_v3, %v1036_v34  ;;  %v927_v47 = vadd.f32 %v1090_v31, %v1036_v34 }
 0x27e   : > { %945 = vst.msk [vmem:[%s1816_s11] sm:$0xff] %vm771_vm2, %v907_v42  ;;  %949 = vst.msk [vmem:[%s1816_s11 + $0x20] sm:$0xff] %vm771_vm2, %v927_v47 }
 0x280   : > { %v1079_v49 = vpop.f32.mrb[2].mxu0  ;;  %v1091_v10 = vpop.f32.mrb[2].mxu1 }
 0x281   : > { %v1080_v52 = vpop.f32.mrb[3].mxu0  ;;  %v1092_v44 = vpop.f32.mrb[3].mxu1 }
 0x282   : > { %v1081_v48 = vadd.f32 %v1080_v52, %v1079_v49  ;;  %v1093_v54 = vadd.f32 %v1092_v44, %v1091_v10 }
 0x284   : > { %v912_v56 = vadd.f32 %v1081_v48, %v1036_v34  ;;  %v932_v58 = vadd.f32 %v1093_v54, %v1036_v34  ;;  %v1082_v59 = vpop.f32.mrb[4].mxu0  ;;  %v1094_v62 = vpop.f32.mrb[4].mxu1 }
 0x285   : > { %v1083_v0 = vpop.f32.mrb[5].mxu0  ;;  %v1095_v60 = vpop.f32.mrb[5].mxu1 }
 0x286   : > { %946 = vst.msk [vmem:[%s1816_s11 + $0x8] sm:$0xff] %vm771_vm2, %v912_v56  ;;  %950 = vst.msk [vmem:[%s1816_s11 + $0x28] sm:$0xff] %vm771_vm2, %v932_v58  ;;  %v1084_v13 = vadd.f32 %v1083_v0, %v1082_v59  ;;  %v1096_v1 = vadd.f32 %v1095_v60, %v1094_v62 }
 0x288   : > { %v917_v61 = vadd.f32 %v1084_v13, %v1036_v34  ;;  %v937_v46 = vadd.f32 %v1096_v1, %v1036_v34  ;;  %v1085_v50 = vpop.f32.mrb[6].mxu0  ;;  %v1097_v11 = vpop.f32.mrb[6].mxu1 }
 0x289   : > { %v1086_v4 = vpop.f32.mrb[7].mxu0  ;;  %v1098_v2 = vpop.f32.mrb[7].mxu1 }
 0x28a   : > { %947 = vst.msk [vmem:[%s1816_s11 + $0x10] sm:$0xff] %vm771_vm2, %v917_v61  ;;  %951 = vst.msk [vmem:[%s1816_s11 + $0x30] sm:$0xff] %vm771_vm2, %v937_v46  ;;  %v1087_v55 = vadd.f32 %v1086_v4, %v1085_v50  ;;  %v1099_v9 = vadd.f32 %v1098_v2, %v1097_v11 }
 0x28c   : > { %v922_v17 = vadd.f32 %v1087_v55, %v1036_v34  ;;  %v942_v20 = vadd.f32 %v1099_v9, %v1036_v34 }
 0x28e   : > { %948 = vst.msk [vmem:[%s1816_s11 + $0x18] sm:$0xff] %vm771_vm2, %v922_v17  ;;  %952 = vst.msk [vmem:[%s1816_s11 + $0x38] sm:$0xff] %vm771_vm2, %v942_v20 }
 0x28f   : > { %1269 = shalt.err (!%p1266_p3)
}
 0x290   : > { %s1270_s6 = scalar_lea.hbm %s1835_s25, 1024  ;;  %s1274_s9 = scalar_lea.hbm %s1889_s3, 2048 }
 0x291   : > { %p1271_p4 = scmp.ne.s32.totalorder %s1835_s25, %s1270_s6  ;;  %p1275_p9 = scmp.lt.u32.totalorder %s1835_s25, %s1889_s3 }
 0x292   : > { %p1276_p10 = scmp.lt.u32.totalorder %s1274_s9, %s1270_s6  ;;  %p1278_p12 = scmp.lt.u32.totalorder %s1270_s6, %s1835_s25 }
 0x293   : > { %p1272_p7 = pnand %p1271_p4, %p1388_p5 }
 0x294   : > { %p1277_p11 = por %p1276_p10, %p1275_p9 }
 0x295   : > { %p1273_p8 = pneg %p1272_p7 }
 0x296   : > { %p1279_p13 = por %p1278_p12, %p1277_p11 }
 0x298   : > { %p1280_p0 = pnand %p1279_p13, %p1273_p8 }
 0x29a   : > { %1283 = shalt.err (!%p1280_p0)
}
 0x29b   : > { %s1328_s5 = smov 128   ;;  %s1329_s10 = smov 8  }
 0x29c   : > { %1148 = dma.vmem_to_hbm [thread:$0]  (%p1388_p5), %s1837_s19, 1024, %s1835_s25, %s1845_s16, %s1328_s5, %s1328_s5, %s1329_s10  }
 0x29d PF: > { %p1154_p1 = scmp.ge.s32.totalorder %s1318_s15, 2  ;;  %s982_s11 = sand.u32 1, %s1306_s12  }
 0x29e   : > { %s983_s17 = scalar_lea.sflag [#allocation3], %s982_s11 }
 0x29f   : > { %p1151_p2 = pnand %p1154_p1, %p1392_p6 }
 0x2a1   : > { %1301 = dma.done.wait (!%p1151_p2), %s983_s17, 1024  }
 0x2a2   : > { %1303 = vsyncadd (!%p1151_p2), %s983_s17, 4294966272  ;;  %p13_p3 = scmp.ge.s32.totalorder %s1375_s18, 4   ;;  %s1892_s12 = smov %s1310_s13 }
 0x2a3   : > { %s1893_s13 = smov %s1314_s14  ;;  %s1894_s14 = smov %s1386_s21 }
 0x2a4   : > { %s1895_s15 = smov %s1375_s18  ;;  %15 = sbr.rel (!%p13_p3) target bundleno = 3 (0x3), region = 67 }
 0x2ab   :  { %988 = vsyncpa [#allocation3], 1 }
 0x2ac   :  { %990 = vsyncpa [#allocation3 + $0x1], 1 }

</bundles_post_ra>
